<compile_context>
chip_gen: v5e
topology: v5e:2x2
jax: 0.10.0
libtpu: 0.0.40
codegen_flags: <defaults>
</compile_context>

<pallas_src>
import functools

import numpy as np
import jax
import jax.numpy as jnp
from jax import lax
from jax.experimental import pallas as pl
from jax.experimental.pallas import tpu as pltpu

POOL_SIZES = (1, 2, 3, 6)
P_OFFS = (0, 1, 5, 14)        # column offset of each branch inside the packed axis
P_PACK = 64                   # packed pooled-pixel axis (>= 1+4+9+36), lane padded
VMEM_LIMIT_BYTES = 64 * 1024 * 1024


# ----------------------------------------------------------------------------
# Pallas kernels
# ----------------------------------------------------------------------------
def branch_kernel(x_ref, wb_ref, mp_ref, scale_ref, shift_ref, o_ref):
    """All four PSP branches for one sample (one grid step) -> pooled activations.

    pooled = x @ Mp                  adaptive avg pool on all four grids at once
    conv   = Wb @ pooled             stacked 1x1 convs (branch b owns rows b*Cb:(b+1)*Cb)
    act    = relu(conv*scale+shift)  BN; scale/shift are zero outside each
                                     branch's own packed columns (masking)

    Only `act` (C, P_PACK) leaves the kernel; the bilinear upsample back to
    (H, W) runs inside the tail kernel, so the full-resolution branch map never
    round-trips HBM.
    """
    x = x_ref[0]                                                        # (C, HW)
    pooled = jnp.dot(x, mp_ref[...],
                     preferred_element_type=jnp.float32)                # (C, 64)
    conv = jnp.dot(wb_ref[...], pooled.astype(wb_ref.dtype),
                   preferred_element_type=jnp.float32)                  # (C, 64)
    act = jnp.maximum(conv * scale_ref[...] + shift_ref[...], 0.0)      # (C, 64)
    o_ref[0] = act.astype(o_ref.dtype)


def tail_kernel(x_ref, act_ref, bp_ref, w1x_ref, w1b_ref, mask_ref,
                shift_ref, w2_ref, bias_ref, o_ref, *, width):
    """Tail for one sample: in-VMEM branch upsample -> 3x3 conv (9 taps, two
    matmuls per tap over the x-half and branch-half channels) -> BN(shift) ->
    ReLU -> 1x1 conv + bias.

    The (x, branches) concat never exists; spatial shifts are static
    `pltpu.roll` lane rotations of the flattened HW axis combined with
    precomputed border masks (zero padding), so no slices are materialized.
    """
    x = x_ref[0]                                                        # (C, HW)
    # Upsample the packed branch activations here; Bp stays resident in VMEM.
    br = jnp.dot(act_ref[0], bp_ref[...],
                 preferred_element_type=jnp.float32).astype(x.dtype)    # (C, HW)
    hw = x.shape[1]
    cb = w1x_ref.shape[1]
    acc = jnp.zeros((cb, hw), jnp.float32)
    for t in range(9):                              # static, fully unrolled
        dy, dx = t // 3 - 1, t % 3 - 1
        delta = dy * width + dx
        if delta == 0:
            xs, bs = x, br
        else:
            # shifted[c, i] == orig[c, (i + delta) mod HW]; out-of-bounds taps
            # are zeroed by the per-tap border mask below.  The rolls run on
            # the XLU slot, which is idle while the MXU is busy.
            s = (-delta) % hw
            xs = pltpu.roll(x, shift=s, axis=1)
            bs = pltpu.roll(br, shift=s, axis=1)
        contrib = (jnp.dot(w1x_ref[t], xs, preferred_element_type=jnp.float32)
                   + jnp.dot(w1b_ref[t], bs, preferred_element_type=jnp.float32))
        if delta == 0:
            acc = acc + contrib                       # center-tap mask is all ones
        else:
            acc = acc + contrib * mask_ref[t]         # zero wrapped border taps
    t_act = jnp.maximum(acc + shift_ref[...], 0.0)    # BN shift (scale folded) + ReLU
    # TODO(synk): Dropout2d(0.1) is a no-op in eval mode; training-mode channel
    # dropout is not implemented here.
    out = jnp.dot(w2_ref[...], t_act.astype(w2_ref.dtype),
                  preferred_element_type=jnp.float32) + bias_ref[...]   # (Cout, HW)
    o_ref[0] = out.astype(o_ref.dtype)


# ----------------------------------------------------------------------------
# Static matrices for adaptive pooling / bilinear upsampling / conv masks
# ----------------------------------------------------------------------------
def adaptive_pool_matrix(out_size, in_size):
    m = np.zeros((out_size, in_size), np.float32)
    for i in range(out_size):
        s = (i * in_size) // out_size
        e = -((-(i + 1) * in_size) // out_size)   # ceil
        m[i, s:e] = 1.0 / (e - s)
    return m


def bilinear_matrix(out_size, in_size):
    """align_corners=True upsampling matrix (out_size, in_size)."""
    m = np.zeros((out_size, in_size), np.float32)
    if in_size == 1:
        m[:, 0] = 1.0
        return m
    for i in range(out_size):
        pos = i * (in_size - 1) / (out_size - 1)
        lo = min(int(np.floor(pos)), in_size - 2)
        frac = pos - lo
        m[i, lo] += 1.0 - frac
        m[i, lo + 1] += frac
    return m


def build_packed_matrices(H, W):
    """Packed pooling (HW, 64) and upsampling (64, HW) matrices for all branches."""
    HW = H * W
    Mp = np.zeros((HW, P_PACK), np.float32)
    Bp = np.zeros((P_PACK, HW), np.float32)
    for b, k in enumerate(POOL_SIZES):
        o = P_OFFS[b]
        M = np.kron(adaptive_pool_matrix(k, H), adaptive_pool_matrix(k, W))  # (k*k, HW)
        Mp[:, o:o + k * k] = M.T
        U = np.kron(bilinear_matrix(H, k), bilinear_matrix(W, k))            # (HW, k*k)
        Bp[o:o + k * k, :] = U.T
    return Mp, Bp


def build_branch_affine(scale_b, shift_b):
    """Per-(channel, packed-pixel) BN scale/shift, zeroed outside each branch's
    own pooled columns so relu(0*x + 0) = 0 masks cross-branch contributions."""
    Cb = scale_b.shape[1]
    C = 4 * Cb
    cols = np.zeros((4, P_PACK), np.float32)
    for b, k in enumerate(POOL_SIZES):
        cols[b, P_OFFS[b]:P_OFFS[b] + k * k] = 1.0
    cols = jnp.asarray(cols)
    sf = (scale_b[:, :, None] * cols[:, None, :]).reshape(C, P_PACK)
    sh = (shift_b[:, :, None] * cols[:, None, :]).reshape(C, P_PACK)
    return sf.astype(jnp.float32), sh.astype(jnp.float32)


def build_tap_masks(H, W):
    """(9, 1, HW) validity masks for the 3x3 taps (zero padding at the border)."""
    masks = np.zeros((9, 1, H * W), np.float32)
    hh = np.arange(H)[:, None]
    ww = np.arange(W)[None, :]
    for t in range(9):
        dy, dx = t // 3 - 1, t % 3 - 1
        valid = (hh + dy >= 0) & (hh + dy < H) & (ww + dx >= 0) & (ww + dx < W)
        masks[t, 0] = valid.astype(np.float32).reshape(-1)
    return masks


# ----------------------------------------------------------------------------
# Forward pass (Pallas)
# ----------------------------------------------------------------------------
def psp_core_pallas(x, params, compute_dtype=jnp.bfloat16):
    N, C, H, W = x.shape
    HW = H * W
    Cb = C // 4
    Cout = params["w_tail2"].shape[0]
    cdt = compute_dtype
    isz = jnp.dtype(cdt).itemsize

    x_flat = x.reshape(N, C, HW).astype(cdt)

    # ---- branch kernel inputs ------------------------------------------------
    Mp, Bp = build_packed_matrices(H, W)
    Mp = jnp.asarray(Mp, cdt)
    Bp = jnp.asarray(Bp, cdt)
    Wb = params["w_branch"].reshape(C, C).astype(cdt)          # stacked 1x1 convs
    scale_full, shift_full = build_branch_affine(params["scale_b"],
                                                 params["shift_b"])

    branch_cost = pl.CostEstimate(
        flops=N * (2 * C * HW * P_PACK + 2 * C * C * P_PACK + 3 * C * P_PACK),
        transcendentals=0,
        bytes_accessed=(N * C * HW * isz + C * C * isz + HW * P_PACK * isz
                        + 2 * C * P_PACK * 4 + N * C * P_PACK * isz),
    )

    # Output is only the pooled activations (N, C, P_PACK): no feature-map-sized
    # HBM write here (review item 1).
    act = pl.pallas_call(
        branch_kernel,
        out_shape=jax.ShapeDtypeStruct((N, C, P_PACK), cdt),
        grid=(N,),
        in_specs=[
            pl.BlockSpec((1, C, HW), lambda n: (n, 0, 0)),     # x (once per sample)
            pl.BlockSpec((C, C), lambda n: (0, 0)),            # stacked 1x1 weights
            pl.BlockSpec((HW, P_PACK), lambda n: (0, 0)),      # packed pooling matrix
            pl.BlockSpec((C, P_PACK), lambda n: (0, 0)),       # BN scale (+ mask)
            pl.BlockSpec((C, P_PACK), lambda n: (0, 0)),       # BN shift
        ],
        out_specs=pl.BlockSpec((1, C, P_PACK), lambda n: (n, 0, 0)),
        compiler_params=pltpu.CompilerParams(
            dimension_semantics=("parallel",),
            vmem_limit_bytes=VMEM_LIMIT_BYTES),
        cost_estimate=branch_cost,
    )(x_flat, Wb, Mp, scale_full, shift_full)

    # ---- tail kernel inputs ----------------------------------------------------
    # Fold the tail BN scale into the 3x3 weights; split into the x-half and the
    # branch-half of the input channels (no concat in the kernel, review item 2)
    # and reorder to (tap, Cb, C).
    w1 = params["w_tail1"] * params["scale_t"][:, None, None, None]  # (Cb, 2C, 3, 3)
    w1x_taps = jnp.transpose(w1[:, :C], (2, 3, 0, 1)).reshape(9, Cb, C).astype(cdt)
    w1b_taps = jnp.transpose(w1[:, C:], (2, 3, 0, 1)).reshape(9, Cb, C).astype(cdt)
    masks = jnp.asarray(build_tap_masks(H, W))                       # (9, 1, HW)
    shift_t = params["shift_t"].reshape(Cb, 1).astype(jnp.float32)
    w2 = params["w_tail2"].reshape(Cout, Cb).astype(cdt)
    bias_t = params["bias_tail"].reshape(Cout, 1).astype(jnp.float32)

    tail_cost = pl.CostEstimate(
        flops=N * (2 * C * P_PACK * HW            # in-kernel branch upsample
                   + 9 * 4 * Cb * C * HW          # 3x3 conv: 9 taps x 2 halves
                   + 2 * Cout * Cb * HW           # final 1x1 conv
                   + 4 * Cb * HW),                # epilogue
        transcendentals=0,
        bytes_accessed=(N * C * HW * isz + N * C * P_PACK * isz
                        + P_PACK * HW * isz + 2 * 9 * Cb * C * isz
                        + 9 * HW * 4 + N * Cout * HW * 4),
    )

    tail_out = pl.pallas_call(
        functools.partial(tail_kernel, width=W),
        out_shape=jax.ShapeDtypeStruct((N, Cout, HW), jnp.float32),
        grid=(N,),
        in_specs=[
            pl.BlockSpec((1, C, HW), lambda n: (n, 0, 0)),     # x
            pl.BlockSpec((1, C, P_PACK), lambda n: (n, 0, 0)), # branch pooled acts
            pl.BlockSpec((P_PACK, HW), lambda n: (0, 0)),      # packed upsample matrix
            pl.BlockSpec((9, Cb, C), lambda n: (0, 0, 0)),     # 3x3 weights, x half
            pl.BlockSpec((9, Cb, C), lambda n: (0, 0, 0)),     # 3x3 weights, branch half
            pl.BlockSpec((9, 1, HW), lambda n: (0, 0, 0)),     # border masks
            pl.BlockSpec((Cb, 1), lambda n: (0, 0)),           # BN shift
            pl.BlockSpec((Cout, Cb), lambda n: (0, 0)),        # 1x1 weights
            pl.BlockSpec((Cout, 1), lambda n: (0, 0)),         # 1x1 bias
        ],
        out_specs=pl.BlockSpec((1, Cout, HW), lambda n: (n, 0, 0)),  # lane-dense
        compiler_params=pltpu.CompilerParams(
            dimension_semantics=("parallel",),
            vmem_limit_bytes=VMEM_LIMIT_BYTES),
        cost_estimate=tail_cost,
    )(x_flat, act, Bp, w1x_taps, w1b_taps, masks, shift_t, w2, bias_t)

    return tail_out.reshape(N, Cout, H, W)   # NCHW, no transpose needed


# ----------------------------------------------------------------------------
# Pure-JAX reference (independent of the packed-matrix trick) for verification
# ----------------------------------------------------------------------------
def adaptive_avg_pool_ref(x, k):
    _, _, H, W = x.shape
    rows = []
    for i in range(k):
        hs, he = (i * H) // k, -((-(i + 1) * H) // k)
        cols = []
        for j in range(k):
            ws, we = (j * W) // k, -((-(j + 1) * W) // k)
            cols.append(x[:, :, hs:he, ws:we].mean(axis=(2, 3)))
        rows.append(jnp.stack(cols, axis=-1))
    return jnp.stack(rows, axis=-2)  # (N, C, k, k)


def bilinear_up_ref(y, H, W):
    N, C, k, _ = y.shape
    if k == 1:
        return jnp.broadcast_to(y, (N, C, H, W))
    pos_h = np.arange(H) * (k - 1) / (H - 1)
    lo_h = np.minimum(np.floor(pos_h).astype(np.int32), k - 2)
    fr_h = (pos_h - lo_h).astype(np.float32)
    pos_w = np.arange(W) * (k - 1) / (W - 1)
    lo_w = np.minimum(np.floor(pos_w).astype(np.int32), k - 2)
    fr_w = (pos_w - lo_w).astype(np.float32)
    tl = y[:, :, lo_h[:, None], lo_w[None, :]]
    tr = y[:, :, lo_h[:, None], lo_w[None, :] + 1]
    bl = y[:, :, lo_h[:, None] + 1, lo_w[None, :]]
    br = y[:, :, lo_h[:, None] + 1, lo_w[None, :] + 1]
    fh = jnp.asarray(fr_h)[:, None]
    fw = jnp.asarray(fr_w)[None, :]
    return tl * (1 - fh) * (1 - fw) + tr * (1 - fh) * fw + bl * fh * (1 - fw) + br * fh * fw


def psp_core_reference(x, params):
    N, C, H, W = x.shape
    branches = []
    for bi, k in enumerate(POOL_SIZES):
        pooled = adaptive_avg_pool_ref(x, k)
        conv = jnp.einsum('oc,nckl->nokl', params["w_branch"][bi], pooled)
        y = jnp.maximum(conv * params["scale_b"][bi][None, :, None, None]
                        + params["shift_b"][bi][None, :, None, None], 0.0)
        branches.append(bilinear_up_ref(y, H, W))
    cat = jnp.concatenate([x] + branches, axis=1)
    t = lax.conv_general_dilated(cat, params["w_tail1"], (1, 1), ((1, 1), (1, 1)),
                                 dimension_numbers=('NCHW', 'OIHW', 'NCHW'))
    t = jnp.maximum(t * params["scale_t"][None, :, None, None]
                    + params["shift_t"][None, :, None, None], 0.0)
    out = lax.conv_general_dilated(t, params["w_tail2"], (1, 1), 'VALID',
                                   dimension_numbers=('NCHW', 'OIHW', 'NCHW'))
    return out + params["bias_tail"][None, :, None, None]


# ----------------------------------------------------------------------------
def make_params(key, in_channels, out_channels):
    Cb = in_channels // 4
    ks = jax.random.split(key, 14)
    eps = 1e-5

    w_branch = jax.random.normal(ks[0], (4, Cb, in_channels), jnp.float32) * 0.2
    gamma_b = jax.random.uniform(ks[1], (4, Cb), minval=0.5, maxval=1.5)
    beta_b = jax.random.normal(ks[2], (4, Cb)) * 0.1
    mean_b = jax.random.normal(ks[3], (4, Cb)) * 0.1
    var_b = jax.random.uniform(ks[4], (4, Cb), minval=0.5, maxval=1.5)
    scale_b = gamma_b / jnp.sqrt(var_b + eps)
    shift_b = beta_b - mean_b * scale_b

    w_tail1 = jax.random.normal(ks[5], (Cb, 2 * in_channels, 3, 3), jnp.float32) * 0.05
    gamma_t = jax.random.uniform(ks[6], (Cb,), minval=0.5, maxval=1.5)
    beta_t = jax.random.normal(ks[7], (Cb,)) * 0.1
    mean_t = jax.random.normal(ks[8], (Cb,)) * 0.1
    var_t = jax.random.uniform(ks[9], (Cb,), minval=0.5, maxval=1.5)
    scale_t = gamma_t / jnp.sqrt(var_t + eps)
    shift_t = beta_t - mean_t * scale_t

    w_tail2 = jax.random.normal(ks[10], (out_channels, Cb, 1, 1), jnp.float32) * 0.2
    bias_tail = jax.random.normal(ks[11], (out_channels,)) * 0.1

    return dict(w_branch=w_branch, scale_b=scale_b, shift_b=shift_b,
                w_tail1=w_tail1, scale_t=scale_t, shift_t=shift_t,
                w_tail2=w_tail2, bias_tail=bias_tail)


if __name__ == "__main__":
    N, C, H, W = 2, 16, 16, 16          # in_channels=16 -> branch_channels=4
    OUT_CH = 6

    key = jax.random.PRNGKey(0)
    kx, kp = jax.random.split(key)
    x = jax.random.normal(kx, (N, C, H, W), jnp.float32)
    params = make_params(kp, C, OUT_CH)

    ref = jax.block_until_ready(psp_core_reference(x, params))

    # float32 path: tight correctness check against the pure-JAX reference.
    out_f32 = jax.block_until_ready(
        psp_core_pallas(x, params, compute_dtype=jnp.float32))
    assert out_f32.shape == (N, OUT_CH, H, W)
    err_f32 = float(jnp.max(jnp.abs(out_f32 - ref)))
    assert err_f32 < 2e-3, f"f32 path max abs error too large: {err_f32}"

    # bfloat16 MXU path (the production configuration): loose tolerance, since
    # bf16 has an ~8-bit mantissa and the tail accumulates 288-term dot products
    # of O(1) activations.
    out_bf16 = jax.block_until_ready(
        psp_core_pallas(x, params, compute_dtype=jnp.bfloat16))
    assert out_bf16.shape == (N, OUT_CH, H, W)
    err_bf16 = float(jnp.max(jnp.abs(out_bf16 - ref)))
    assert err_bf16 < 1.5e-1, f"bf16 path max abs error too large: {err_bf16}"

    print("KERNEL_OK")
</pallas_src>

<mosaic_0001>
module attributes {stable_mosaic.version = 11 : i64} {
  func.func @branch_kernel(%arg0: i32, %arg1: memref<1x16x256xf32, #tpu.memory_space<vmem>>, %arg2: memref<16x16xf32, #tpu.memory_space<vmem>>, %arg3: memref<256x64xf32, #tpu.memory_space<vmem>>, %arg4: memref<16x64xf32, #tpu.memory_space<vmem>>, %arg5: memref<16x64xf32, #tpu.memory_space<vmem>>, %arg6: memref<1x16x64xf32, #tpu.memory_space<vmem>>) attributes {dimension_semantics = [#tpu.dimension_semantics<parallel>], iteration_bounds = array<i64: 2>, scalar_prefetch = 0 : i64, scratch_operands = 0 : i64, tpu.core_type = #tpu.core_type<tc>, window_params = [{transform_indices = @transform_0, window_bounds = array<i64: 1, 16, 256>}, {pipeline_mode = #tpu.pipeline_mode<synchronous>, transform_indices = @transform_1, window_bounds = array<i64: 16, 16>}, {pipeline_mode = #tpu.pipeline_mode<synchronous>, transform_indices = @transform_2, window_bounds = array<i64: 256, 64>}, {pipeline_mode = #tpu.pipeline_mode<synchronous>, transform_indices = @transform_3, window_bounds = array<i64: 16, 64>}, {pipeline_mode = #tpu.pipeline_mode<synchronous>, transform_indices = @transform_4, window_bounds = array<i64: 16, 64>}, {transform_indices = @transform_5, window_bounds = array<i64: 1, 16, 64>}]} {
    %c0 = arith.constant 0 : index
    %c0_0 = arith.constant 0 : index
    %c0_1 = arith.constant 0 : index
    %0 = vector.load %arg1[%c0, %c0_0, %c0_1] : memref<1x16x256xf32, #tpu.memory_space<vmem>>, vector<1x16x256xf32>
    %1 = vector.shape_cast %0 : vector<1x16x256xf32> to vector<16x256xf32>
    %c0_2 = arith.constant 0 : index
    %c0_3 = arith.constant 0 : index
    %2 = vector.load %arg3[%c0_2, %c0_3] : memref<256x64xf32, #tpu.memory_space<vmem>>, vector<256x64xf32>
    %cst = arith.constant dense<0.000000e+00> : vector<16x64xf32>
    %3 = tpu.matmul %1, %2, %cst {dimension_numbers = #tpu.dot_dimension_numbers<[1], [0], [0], [1], [0, 0, 1, 1], [], []>} : vector<16x256xf32>, vector<256x64xf32>, vector<16x64xf32> -> vector<16x64xf32>
    %c0_4 = arith.constant 0 : index
    %c0_5 = arith.constant 0 : index
    %4 = vector.load %arg2[%c0_4, %c0_5] : memref<16x16xf32, #tpu.memory_space<vmem>>, vector<16x16xf32>
    %cst_6 = arith.constant dense<0.000000e+00> : vector<16x64xf32>
    %5 = tpu.matmul %4, %3, %cst_6 {dimension_numbers = #tpu.dot_dimension_numbers<[1], [0], [0], [1], [0, 0, 1, 1], [], []>} : vector<16x16xf32>, vector<16x64xf32>, vector<16x64xf32> -> vector<16x64xf32>
    %c0_7 = arith.constant 0 : index
    %c0_8 = arith.constant 0 : index
    %6 = vector.load %arg4[%c0_7, %c0_8] : memref<16x64xf32, #tpu.memory_space<vmem>>, vector<16x64xf32>
    %7 = arith.mulf %5, %6 : vector<16x64xf32>
    %c0_9 = arith.constant 0 : index
    %c0_10 = arith.constant 0 : index
    %8 = vector.load %arg5[%c0_9, %c0_10] : memref<16x64xf32, #tpu.memory_space<vmem>>, vector<16x64xf32>
    %9 = arith.addf %7, %8 : vector<16x64xf32>
    %cst_11 = arith.constant 0.000000e+00 : f32
    %10 = vector.broadcast %cst_11 : f32 to vector<16x64xf32>
    %11 = arith.maximumf %9, %10 : vector<16x64xf32>
    %c0_12 = arith.constant 0 : index
    %c0_13 = arith.constant 0 : index
    %c0_14 = arith.constant 0 : index
    %12 = vector.load %arg6[%c0_12, %c0_13, %c0_14] : memref<1x16x64xf32, #tpu.memory_space<vmem>>, vector<1x16x64xf32>
    %13 = vector.shape_cast %12 : vector<1x16x64xf32> to vector<16x64xf32>
    %14 = vector.shape_cast %11 : vector<16x64xf32> to vector<1x16x64xf32>
    tpu.vector_store %arg6[%c0_12, %c0_13, %c0_14], %14 {strides = array<i32>} : memref<1x16x64xf32, #tpu.memory_space<vmem>>, vector<1x16x64xf32>,
    return
  }
  func.func @transform_0(%arg0: i32) -> (i32, i32, i32) {
    %c0_i32 = arith.constant 0 : i32
    %c0_i32_0 = arith.constant 0 : i32
    %c0_i32_1 = arith.constant 0 : i32
    return %arg0, %c0_i32, %c0_i32_0 : i32, i32, i32
  }
  func.func @transform_1(%arg0: i32) -> (i32, i32) {
    %c0_i32 = arith.constant 0 : i32
    %c0_i32_0 = arith.constant 0 : i32
    %c0_i32_1 = arith.constant 0 : i32
    return %c0_i32, %c0_i32_0 : i32, i32
  }
  func.func @transform_2(%arg0: i32) -> (i32, i32) {
    %c0_i32 = arith.constant 0 : i32
    %c0_i32_0 = arith.constant 0 : i32
    %c0_i32_1 = arith.constant 0 : i32
    return %c0_i32, %c0_i32_0 : i32, i32
  }
  func.func @transform_3(%arg0: i32) -> (i32, i32) {
    %c0_i32 = arith.constant 0 : i32
    %c0_i32_0 = arith.constant 0 : i32
    %c0_i32_1 = arith.constant 0 : i32
    return %c0_i32, %c0_i32_0 : i32, i32
  }
  func.func @transform_4(%arg0: i32) -> (i32, i32) {
    %c0_i32 = arith.constant 0 : i32
    %c0_i32_0 = arith.constant 0 : i32
    %c0_i32_1 = arith.constant 0 : i32
    return %c0_i32, %c0_i32_0 : i32, i32
  }
  func.func @transform_5(%arg0: i32) -> (i32, i32, i32) {
    %c0_i32 = arith.constant 0 : i32
    %c0_i32_0 = arith.constant 0 : i32
    %c0_i32_1 = arith.constant 0 : i32
    return %arg0, %c0_i32, %c0_i32_0 : i32, i32, i32
  }
}

</mosaic_0001>

<bundles_post_ra>
// kernel: tpu_custom_call.1
= control target key start
LH: loop header
LB: loop body
LE: loop exit
PB: predicated region body
PF: predicated region fallthrough
CT: control target
= control target key end

     0   :  { %10 = vsyncpa [#allocation3], 0  ;;  %s796_s0 = inlined_call_operand.vmem [shape: f32[2,16,256], index: 0, kind: input, shape index: {}]   ;;  %s797_s1 = inlined_call_operand.vmem [shape: f32[16,16], index: 1, kind: input, shape index: {}]   ;;  %s798_s2 = inlined_call_operand.vmem [shape: f32[256,64], index: 2, kind: input, shape index: {}]   ;;  %s799_s3 = inlined_call_operand.vmem [shape: f32[16,64], index: 3, kind: input, shape index: {}]   ;;  %s800_s4 = inlined_call_operand.vmem [shape: f32[16,64], index: 4, kind: input, shape index: {}]   ;;  %s801_s5 = inlined_call_operand.hbm [shape: f32[2,16,64], index: 5, kind: output, shape index: {}]  }
   0x1   :  { %12 = vsyncpa [#allocation3 + $0x1], 0  ;;  %s597_s18 = smov 0   ;;  %s599_s19 = smov 0  }
   0x2   :  { %s601_s20 = smov 0   ;;  %s603_s21 = smov 0  }
   0x3 LB: > { %s618_s22 = sadd.s32 4294967295, %s563_s21   ;;  %s428_s23 = sadd.s32 4294967294, %s563_s21   ;;  %s563_s21 = sphi %s603_s21, %s807_s21   ;;  %s559_s20 = sphi %s601_s20, %s806_s20   ;;  %s555_s19 = sphi %s599_s19, %s805_s19   ;;  %s551_s18 = sphi %s597_s18, %s804_s18  }
   0x4   : > { %s622_s24 = sadd.s32 1, %s563_s21   ;;  %s135_s25 = sadd.s32 1, %s559_s20 }
   0x5   : > { %s132_s26 = ssub.s32 %s563_s21, %s622_s24  ;;  %p145_p0 = scmp.ne.s32.totalorder %s559_s20, %s555_s19 }
   0x6   : > { %p133_p1 = scmp.eq.s32.totalorder %s132_s26, 0  ;;  %p146_p2 = scmp.eq.s32.totalorder %s618_s22, 1 }
   0x7   : > { %p151_p3 = scmp.ne.s32.totalorder %s555_s19, %s551_s18  ;;  %p152_p4 = scmp.eq.s32.totalorder %s428_s23, 1 }
   0x8   : > { %s633_s27 = scalar_select %p133_p1, %s559_s20, %s135_s25  }
   0x9   : > { %p635_p5 = por %p146_p2, %p145_p0  ;;  %p639_p6 = por %p152_p4, %p151_p3 }
   0xa   : > { %p431_p7 = scmp.ge.s32.totalorder %s563_s21, 1  ;;  %p190_p8 = scmp.lt.s32.totalorder %s563_s21, 3 }
   0xc   : > { %p191_p9 = pnand %p431_p7, %p190_p8 }
   0xd   : > { %p218_p10 = scmp.lt.s32.totalorder (!%p191_p9), %s618_s22, 1  ;;  %s215_s14 = sand.u32 (!%p191_p9), 1, %s555_s19  }
   0xe   : > { %194 = sbr.rel (%p191_p9) target bundleno = 341 (0x155), region = 40  ;;  %s443_s26 = sshll.u32 (!%p191_p9), %s618_s22, 4 }
   0xf   : > { %s362_s9 = scalar_lea.hbm (!%p191_p9), %s801_s5, %s443_s26  ;;  %s351_s15 = scalar_lea.sflag (!%p191_p9), [#allocation3], %s215_s14 }
  0x10   : > { %s365_s13 = sshll.u32 (!%p191_p9), %s362_s9, 4  ;;  %s521_s26 = scalar_lea.hbm (!%p191_p9), %s801_s5, 32  ;;  %s366_s13 = int_to_ptr.hbm [resolvable:$true] %s365_s13 }
  0x11   : > { %s515_s16 = sshra.s32 (!%p191_p9), %s366_s13, 4  ;;  %s516_s16 = int_to_ptr.hbm [resolvable:$true] %s515_s16 }
  0x12   : > { %s517_s23 = scalar_lea.hbm (!%p191_p9), %s516_s16, 16  ;;  %p522_p0 = scmp.lt.s32.totalorder (!%p191_p9), %s516_s16, %s801_s5 }
  0x13   : > { %v242_v0 = vld [vmem:[%s798_s2 + $0x78] sm:$0xff]  ;;  %v241_v2 = vld [vmem:[%s798_s2 + $0x70] sm:$0xff]  ;;  %v240_v4 = vld [vmem:[%s798_s2 + $0x68] sm:$0xff]  ;;  %s219_s17 = scalar_select %p218_p10, %s618_s22, 1  ;;  %vm307_vm0 = vcmask 130048   ;;  %vm347_vm1 = vcmask 523264  }
  0x14   : > { %v258_v1 = vld [vmem:[%s798_s2 + $0xf8] sm:$0xff]  ;;  %259 = vmatpush.msra.mxu0 %v242_v0  ;;  %v257_v3 = vld [vmem:[%s798_s2 + $0xf0] sm:$0xff]  ;;  %444 = vmatpush.msra.mxu3 %v242_v0  ;;  %v256_v5 = vld [vmem:[%s798_s2 + $0xe8] sm:$0xff]  ;;  %p518_p11 = scmp.ne.s32.totalorder %s516_s16, %s517_s23  ;;  %p523_p1 = scmp.lt.s32.totalorder %s521_s26, %s517_s23 }
  0x15   : > { %282 = vmatpush.msra.mxu1 %v258_v1  ;;  %v239_v6 = vld [vmem:[%s798_s2 + $0x60] sm:$0xff]  ;;  %v238_v8 = vld [vmem:[%s798_s2 + $0x58] sm:$0xff]  ;;  %v237_v10 = vld [vmem:[%s798_s2 + $0x50] sm:$0xff]  ;;  %s442_s10 = sshll.u32 %s219_s17, 5  ;;  %s432_s17 = sshll.u32 %s215_s14, 4 }
  0x16   : > { %260 = vmatpush.msra.mxu0 %v241_v2  ;;  %445 = vmatpush.msra.mxu3 %v241_v2  ;;  %v255_v7 = vld [vmem:[%s798_s2 + $0xe0] sm:$0xff]  ;;  %v254_v9 = vld [vmem:[%s798_s2 + $0xd8] sm:$0xff]  ;;  %v253_v11 = vld [vmem:[%s798_s2 + $0xd0] sm:$0xff]  ;;  %s222_s30 = scalar_lea.vmem %s796_s0, %s442_s10  ;;  %s217_s10 = scalar_lea.vmem [#allocation2], %s432_s17 }
  0x17   : > { %283 = vmatpush.msra.mxu1 %v257_v3  ;;  %v236_v12 = vld [vmem:[%s798_s2 + $0x48] sm:$0xff]  ;;  %v235_v14 = vld [vmem:[%s798_s2 + $0x40] sm:$0xff]  ;;  %v234_v16 = vld [vmem:[%s798_s2 + $0x38] sm:$0xff]  ;;  %s363_s22 = sshll.u32 %s217_s10, 4  ;;  %p519_p12 = pnand %p518_p11, %p635_p5  ;;  %s364_s22 = int_to_ptr.vmem [resolvable:$true] %s363_s22 }
  0x18   : > { %261 = vmatpush.msra.mxu0 %v240_v4  ;;  %446 = vmatpush.msra.mxu3 %v240_v4  ;;  %v252_v13 = vld [vmem:[%s798_s2 + $0xc8] sm:$0xff]  ;;  %v251_v15 = vld [vmem:[%s798_s2 + $0xc0] sm:$0xff]  ;;  %v250_v17 = vld [vmem:[%s798_s2 + $0xb8] sm:$0xff]  ;;  %p524_p2 = por %p523_p1, %p522_p0 }
  0x19   : > { %284 = vmatpush.msra.mxu1 %v256_v5  ;;  %v233_v18 = vld [vmem:[%s798_s2 + $0x30] sm:$0xff]  ;;  %v232_v20 = vld [vmem:[%s798_s2 + $0x28] sm:$0xff]  ;;  %v231_v22 = vld [vmem:[%s798_s2 + $0x20] sm:$0xff]  ;;  %p520_p13 = pneg %p519_p12 }
  0x1a   : > { %262 = vmatpush.msra.mxu0 %v239_v6  ;;  %447 = vmatpush.msra.mxu3 %v239_v6  ;;  %v249_v19 = vld [vmem:[%s798_s2 + $0xb0] sm:$0xff]  ;;  %v248_v21 = vld [vmem:[%s798_s2 + $0xa8] sm:$0xff]  ;;  %v247_v23 = vld [vmem:[%s798_s2 + $0xa0] sm:$0xff] }
  0x1b   : > { %285 = vmatpush.msra.mxu1 %v255_v7  ;;  %v230_v24 = vld [vmem:[%s798_s2 + $0x18] sm:$0xff]  ;;  %v229_v26 = vld [vmem:[%s798_s2 + $0x10] sm:$0xff]  ;;  %v228_v28 = vld [vmem:[%s798_s2 + $0x8] sm:$0xff]  ;;  %p525_p3 = pnand %p524_p2, %p520_p13 }
  0x1c   : > { %263 = vmatpush.msra.mxu0 %v238_v8  ;;  %448 = vmatpush.msra.mxu3 %v238_v8  ;;  %v246_v25 = vld [vmem:[%s798_s2 + $0x98] sm:$0xff]  ;;  %v245_v27 = vld [vmem:[%s798_s2 + $0x90] sm:$0xff]  ;;  %v244_v29 = vld [vmem:[%s798_s2 + $0x88] sm:$0xff] }
  0x1d   : > { %286 = vmatpush.msra.mxu1 %v254_v9  ;;  %v227_v30 = vld [vmem:[%s798_s2] sm:$0xff]  ;;  %v224_v33 = vld [vmem:[%s222_s30 + $0x8] sm:$0xff]  ;;  %v225_v34 = vld [vmem:[%s222_s30 + $0x10] sm:$0xff] }
  0x1e   : > { %264 = vmatpush.msra.mxu0 %v237_v10  ;;  %449 = vmatpush.msra.mxu3 %v237_v10  ;;  %v243_v31 = vld [vmem:[%s798_s2 + $0x80] sm:$0xff]  ;;  %v226_v35 = vld [vmem:[%s222_s30 + $0x18] sm:$0xff]  ;;  %v306_v43 = vld [vmem:[%s797_s1 + $0x8] sm:$0xff] }
  0x1f   : > { %287 = vmatpush.msra.mxu1 %v253_v11  ;;  %v223_v32 = vld [vmem:[%s222_s30] sm:$0xff]  ;;  %v338_v50 = vld [vmem:[%s799_s3 + $0x8] sm:$0xff] }
  0x20   : > { %265 = vmatpush.msra.mxu0 %v236_v12  ;;  %450 = vmatpush.msra.mxu3 %v236_v12  ;;  %v305_v42 = vld [vmem:[%s797_s1] sm:$0xff]  ;;  %v342_v52 = vld [vmem:[%s800_s4 + $0x8] sm:$0xff] }
  0x21   : > { %288 = vmatpush.msra.mxu1 %v252_v13  ;;  %v337_v44 = vld [vmem:[%s799_s3] sm:$0xff] }
  0x22   : > { %266 = vmatpush.msra.mxu0 %v235_v14  ;;  %451 = vmatpush.msra.mxu3 %v235_v14  ;;  %v341_v46 = vld [vmem:[%s800_s4] sm:$0xff] }
  0x23   : > { %289 = vmatpush.msra.mxu1 %v251_v15 }
  0x24   : > { %267 = vmatpush.msra.mxu0 %v234_v16  ;;  %452 = vmatpush.msra.mxu3 %v234_v16 }
  0x25   : > { %290 = vmatpush.msra.mxu1 %v250_v17 }
  0x26   : > { %268 = vmatpush.msra.mxu0 %v233_v18  ;;  %453 = vmatpush.msra.mxu3 %v233_v18 }
  0x27   : > { %291 = vmatpush.msra.mxu1 %v249_v19 }
  0x28   : > { %269 = vmatpush.msra.mxu0 %v232_v20  ;;  %454 = vmatpush.msra.mxu3 %v232_v20 }
  0x29   : > { %292 = vmatpush.msra.mxu1 %v248_v21 }
  0x2a   : > { %270 = vmatpush.msra.mxu0 %v231_v22  ;;  %455 = vmatpush.msra.mxu3 %v231_v22 }
  0x2b   : > { %293 = vmatpush.msra.mxu1 %v247_v23 }
  0x2c   : > { %271 = vmatpush.msra.mxu0 %v230_v24  ;;  %456 = vmatpush.msra.mxu3 %v230_v24 }
  0x2d   : > { %294 = vmatpush.msra.mxu1 %v246_v25 }
  0x2e   : > { %272 = vmatpush.msra.mxu0 %v229_v26  ;;  %457 = vmatpush.msra.mxu3 %v229_v26 }
  0x2f   : > { %295 = vmatpush.msra.mxu1 %v245_v27 }
  0x30   : > { %273 = vmatpush.msra.mxu0 %v228_v28  ;;  %458 = vmatpush.msra.mxu3 %v228_v28 }
  0x31   : > { %296 = vmatpush.msra.mxu1 %v244_v29 }
  0x32   : > { %274 = vmatpush.msra.mxu0 %v227_v30  ;;  %459 = vmatpush.msra.mxu3 %v227_v30 }
  0x33   : > { %297 = vmatpush.msra.mxu1 %v243_v31  ;;  %275 = vmatmul.f32.vlgmr.msra.gmra.mxu0 %v223_v32 }
  0x34   : > { %298 = vmatmul.f32.vlgmr.msra.gmra.mxu1 %v224_v33  ;;  %278 = vmatmul.f32.vlgmr.msra.gmra.mxu3 %v225_v34 }
  0x3c   : > { %301 = vmatmul.f32.gmra.mxu1 %v226_v35 }
  0xb0   : > { %v276_v37 = vpop.f32.mrf.mxu0 }
  0xb1   : > { %v299_v36 = vpop.f32.mrf.mxu1 }
  0xb2   : > { %v300_v41 = vadd.f32 %v299_v36, %v276_v37 }
  0xb7   : > { %v279_v38 = vpop.f32.mrf.mxu3 }
  0xb9   : > { %v302_v39 = vpop.f32.mrf.mxu1 }
  0xba   : > { %v303_v40 = vadd.f32 %v302_v39, %v279_v38 }
  0xbc   : > { %328 = vmatpush.msra.mxu2 %v303_v40 }
  0xbe   : > { %329 = vmatpush.msra.mxu2 %v300_v41 }
  0xbf   : > { %435 = vmatmul.msk.f32.vlgmr.msra.gmra.mxu2 %vm307_vm0, %v305_v42 }
  0xc7   : > { %436 = vmatmul.msk.f32.gmra.mxu2 %vm307_vm0, %v306_v43 }
 0x142   : > { %v331_v45 = vpop.f32.mrf.mxu2 }
 0x143   : > { %v339_v47 = vmul.f32 %v337_v44, %v331_v45 }
 0x145   : > { %v343_v48 = vadd.f32 %v341_v46, %v339_v47 }
 0x147   : > { %v345_v49 = vmax.f32 %v343_v48, 0.0 }
 0x149   : > { %348 = vst.msk [vmem:[%s217_s10] sm:$0xff] %vm347_vm1, %v345_v49 }
 0x14a   : > { %v334_v51 = vpop.f32.mrf.mxu2 }
 0x14b   : > { %v340_v53 = vmul.f32 %v338_v50, %v334_v51 }
 0x14d   : > { %v344_v54 = vadd.f32 %v342_v52, %v340_v53 }
 0x14f   : > { %v346_v55 = vmax.f32 %v344_v54, 0.0 }
 0x151   : > { %349 = vst.msk [vmem:[%s217_s10 + $0x8] sm:$0xff] %vm347_vm1, %v346_v55 }
 0x152   : > { %528 = shalt.err (!%p525_p3)
}
 0x153   : > { %s565_s14 = smov 128   ;;  %s566_s7 = smov 8  }
 0x154   : > { %460 = dma.vmem_to_hbm [thread:$0]  (%p635_p5), %s364_s22, 256, %s366_s13, %s351_s15, %s565_s14, %s565_s14, %s566_s7  }
 0x155 PF: > { %p466_p4 = scmp.ge.s32.totalorder %s563_s21, 2  ;;  %s380_s8 = sand.u32 1, %s551_s18  }
 0x156   : > { %s381_s9 = scalar_lea.sflag [#allocation3], %s380_s8 }
 0x157   : > { %p463_p7 = pnand %p466_p4, %p639_p6 }
 0x159   : > { %p464_p8 = pneg %p463_p7 }
 0x15b   : > { %546 = dma.done.wait (%p464_p8), %s381_s9, 256  }
 0x15c   : > { %548 = vsyncadd (%p464_p8), %s381_s9, 4294967040  ;;  %p15_p9 = scmp.ge.s32.totalorder %s622_s24, 4   ;;  %s804_s18 = smov %s555_s19 }
 0x15d   : > { %s805_s19 = smov %s559_s20  ;;  %s806_s20 = smov %s633_s27 }
 0x15e   : > { %s807_s21 = smov %s622_s24  ;;  %17 = sbr.rel (!%p15_p9) target bundleno = 3 (0x3), region = 75 }
 0x163   :  { %387 = vsyncpa [#allocation3], 1 }
 0x164   :  { %389 = vsyncpa [#allocation3 + $0x1], 1 }

</bundles_post_ra>
